<compile_context>
chip_gen: v6e
topology: v6e:2x2x1
jax: 0.10.0
libtpu: 0.0.40
codegen_flags: <defaults>
</compile_context>

<pallas_src>
import functools

import jax
import jax.numpy as jnp
from jax import lax
from jax.experimental import pallas as pl
from jax.experimental.pallas import tpu as pltpu


def _sdp_att_kernel(q_ref, k_ref, v_ref, out_ref, attn_ref, *,
                    num_heads, head_dim, emb_size):
    # Refs for one batch element:
    #   q_ref / k_ref / v_ref : (1, S, E)
    #   out_ref               : (1, S, E)   (already merged-heads layout)
    #   attn_ref              : (1, H, S, S)
    inv_sqrt_e = 1.0 / float(emb_size) ** 0.5
    q = q_ref[0] * inv_sqrt_e            # fold scale into q: S*E mults, not H*S*S
    k = k_ref[0]
    v = v_ref[0]

    # Per-head scores; short static loop, unrolled at trace time.
    scores = []
    for h in range(num_heads):
        lo = h * head_dim
        q_h = q[:, lo:lo + head_dim]     # (S, D)
        k_h = k[:, lo:lo + head_dim]     # (S, D)
        # scores[i, j] = <q_i, k_j> / sqrt(E); contract over D without k_h.T
        scores.append(lax.dot_general(
            q_h, k_h,
            dimension_numbers=(((1,), (1,)), ((), ())),
            preferred_element_type=jnp.float32))         # (S, S)
    s = jnp.stack(scores, axis=0)                        # (H, S, S)

    # One vectorized softmax over keys (last dim) for all heads at once;
    # exact reciprocal keeps 1e-5 parity with the reference.
    m = jnp.max(s, axis=-1, keepdims=True)
    e = jnp.exp(s - m)
    denom = jnp.sum(e, axis=-1, keepdims=True)
    attn = e * pl.reciprocal(denom, approx=False)        # (H, S, S)
    attn_ref[0] = attn.astype(attn_ref.dtype)            # single (H, S, S) store

    # einsum('bhij,bhkl->bhjl') == outer(sum_i attn_h[i, :], sum_k v_h[k, :]).
    # v's column sum is shared across heads (each head just reads its E-slice).
    col_sums = jnp.sum(attn, axis=1)                     # (H, S)  index j
    v_sum = jnp.sum(v, axis=0)                           # (E,)    index l (packed)

    head_outs = []
    for h in range(num_heads):
        lo = h * head_dim
        head_outs.append(
            col_sums[h][:, None] * v_sum[lo:lo + head_dim][None, :])  # (S, D)

    # Single lane-dense (S, E) store, already in the merged-heads layout.
    out_ref[0] = jnp.concatenate(head_outs, axis=1).astype(out_ref.dtype)


def scale_dot_product_att(q, k, v, *, num_heads):
    """q, k, v: (B, S, E) float32. Returns (result (B, S, E), attn (B, H, S, S))."""
    B, S, E = q.shape
    H = num_heads
    D = E // H

    kernel = functools.partial(
        _sdp_att_kernel, num_heads=H, head_dim=D, emb_size=E)

    spec_bse = pl.BlockSpec((1, S, E), lambda b: (b, 0, 0))
    spec_attn = pl.BlockSpec((1, H, S, S), lambda b: (b, 0, 0, 0))

    result, attn = pl.pallas_call(
        kernel,
        out_shape=(
            jax.ShapeDtypeStruct((B, S, E), jnp.float32),
            jax.ShapeDtypeStruct((B, H, S, S), jnp.float32),
        ),
        grid_spec=pltpu.PrefetchScalarGridSpec(
            num_scalar_prefetch=0,
            grid=(B,),
            in_specs=[spec_bse, spec_bse, spec_bse],
            out_specs=[spec_bse, spec_attn],
        ),
        compiler_params=pltpu.CompilerParams(
            dimension_semantics=("parallel",)),
    )(q, k, v)
    return result, attn


def _reference(q, k, v, num_heads):
    """Pure-JAX replica of the PyTorch forward (for verification)."""
    B, S, E = q.shape
    H, D = num_heads, E // num_heads
    split = lambda x: jnp.transpose(x.reshape(B, S, H, D), (0, 2, 1, 3))
    qs, ks, vs = split(q), split(k), split(v)
    scores = jnp.einsum('bhqd,bhkd->bhqk', qs, ks) / jnp.sqrt(jnp.float32(E))
    attn = jax.nn.softmax(scores, axis=-1)
    res = jnp.einsum('bhij,bhkl->bhjl', attn, vs)
    res = jnp.transpose(res, (0, 2, 1, 3)).reshape(B, S, E)
    return res, attn


if __name__ == "__main__":
    # Small shapes consistent with the module: batch=2, seq=8, heads=4, emb=32.
    B, S, H, E = 2, 8, 4, 32
    key = jax.random.PRNGKey(0)
    kq, kk, kv = jax.random.split(key, 3)
    q = jax.random.normal(kq, (B, S, E), dtype=jnp.float32)
    k = jax.random.normal(kk, (B, S, E), dtype=jnp.float32)
    v = jax.random.normal(kv, (B, S, E), dtype=jnp.float32)

    result, attn = scale_dot_product_att(q, k, v, num_heads=H)
    jax.block_until_ready((result, attn))

    ref_result, ref_attn = _reference(q, k, v, H)
    assert jnp.allclose(result, ref_result, atol=1e-4, rtol=1e-4)
    assert jnp.allclose(attn, ref_attn, atol=1e-5, rtol=1e-5)

    print("KERNEL_OK")
</pallas_src>

<mosaic_0001>
module attributes {stable_mosaic.version = 11 : i64} {
  func.func @_sdp_att_kernel(%arg0: i32, %arg1: memref<1x8x32xf32, #tpu.memory_space<vmem>>, %arg2: memref<1x8x32xf32, #tpu.memory_space<vmem>>, %arg3: memref<1x8x32xf32, #tpu.memory_space<vmem>>, %arg4: memref<1x8x32xf32, #tpu.memory_space<vmem>>, %arg5: memref<1x4x8x8xf32, #tpu.memory_space<vmem>>) attributes {dimension_semantics = [#tpu.dimension_semantics<parallel>], iteration_bounds = array<i64: 2>, scalar_prefetch = 0 : i64, scratch_operands = 0 : i64, tpu.core_type = #tpu.core_type<tc>, window_params = [{transform_indices = @transform_0, window_bounds = array<i64: 1, 8, 32>}, {transform_indices = @transform_1, window_bounds = array<i64: 1, 8, 32>}, {transform_indices = @transform_2, window_bounds = array<i64: 1, 8, 32>}, {transform_indices = @transform_3, window_bounds = array<i64: 1, 8, 32>}, {transform_indices = @transform_4, window_bounds = array<i64: 1, 4, 8, 8>}]} {
    %c0 = arith.constant 0 : index
    %c0_0 = arith.constant 0 : index
    %c0_1 = arith.constant 0 : index
    %0 = vector.load %arg1[%c0, %c0_0, %c0_1] : memref<1x8x32xf32, #tpu.memory_space<vmem>>, vector<1x8x32xf32>
    %1 = vector.shape_cast %0 : vector<1x8x32xf32> to vector<8x32xf32>
    %cst = arith.constant 0.176776692 : f32
    %2 = vector.broadcast %cst : f32 to vector<8x32xf32>
    %3 = arith.mulf %1, %2 : vector<8x32xf32>
    %c0_2 = arith.constant 0 : index
    %c0_3 = arith.constant 0 : index
    %c0_4 = arith.constant 0 : index
    %4 = vector.load %arg2[%c0_2, %c0_3, %c0_4] : memref<1x8x32xf32, #tpu.memory_space<vmem>>, vector<1x8x32xf32>
    %5 = vector.shape_cast %4 : vector<1x8x32xf32> to vector<8x32xf32>
    %c0_5 = arith.constant 0 : index
    %c0_6 = arith.constant 0 : index
    %c0_7 = arith.constant 0 : index
    %6 = vector.load %arg3[%c0_5, %c0_6, %c0_7] : memref<1x8x32xf32, #tpu.memory_space<vmem>>, vector<1x8x32xf32>
    %7 = vector.shape_cast %6 : vector<1x8x32xf32> to vector<8x32xf32>
    %8 = vector.extract_strided_slice %3 {offsets = [0, 0], sizes = [8, 8], strides = [1, 1]} : vector<8x32xf32> to vector<8x8xf32>
    %9 = vector.extract_strided_slice %5 {offsets = [0, 0], sizes = [8, 8], strides = [1, 1]} : vector<8x32xf32> to vector<8x8xf32>
    %cst_8 = arith.constant dense<0.000000e+00> : vector<8x8xf32>
    %10 = tpu.matmul %8, %9, %cst_8 {dimension_numbers = #tpu.dot_dimension_numbers<[1], [1], [0], [0], [0, 0, 1, 0], [], []>} : vector<8x8xf32>, vector<8x8xf32>, vector<8x8xf32> -> vector<8x8xf32>
    %11 = vector.extract_strided_slice %3 {offsets = [0, 8], sizes = [8, 8], strides = [1, 1]} : vector<8x32xf32> to vector<8x8xf32>
    %12 = vector.extract_strided_slice %5 {offsets = [0, 8], sizes = [8, 8], strides = [1, 1]} : vector<8x32xf32> to vector<8x8xf32>
    %cst_9 = arith.constant dense<0.000000e+00> : vector<8x8xf32>
    %13 = tpu.matmul %11, %12, %cst_9 {dimension_numbers = #tpu.dot_dimension_numbers<[1], [1], [0], [0], [0, 0, 1, 0], [], []>} : vector<8x8xf32>, vector<8x8xf32>, vector<8x8xf32> -> vector<8x8xf32>
    %14 = vector.extract_strided_slice %3 {offsets = [0, 16], sizes = [8, 8], strides = [1, 1]} : vector<8x32xf32> to vector<8x8xf32>
    %15 = vector.extract_strided_slice %5 {offsets = [0, 16], sizes = [8, 8], strides = [1, 1]} : vector<8x32xf32> to vector<8x8xf32>
    %cst_10 = arith.constant dense<0.000000e+00> : vector<8x8xf32>
    %16 = tpu.matmul %14, %15, %cst_10 {dimension_numbers = #tpu.dot_dimension_numbers<[1], [1], [0], [0], [0, 0, 1, 0], [], []>} : vector<8x8xf32>, vector<8x8xf32>, vector<8x8xf32> -> vector<8x8xf32>
    %17 = vector.extract_strided_slice %3 {offsets = [0, 24], sizes = [8, 8], strides = [1, 1]} : vector<8x32xf32> to vector<8x8xf32>
    %18 = vector.extract_strided_slice %5 {offsets = [0, 24], sizes = [8, 8], strides = [1, 1]} : vector<8x32xf32> to vector<8x8xf32>
    %cst_11 = arith.constant dense<0.000000e+00> : vector<8x8xf32>
    %19 = tpu.matmul %17, %18, %cst_11 {dimension_numbers = #tpu.dot_dimension_numbers<[1], [1], [0], [0], [0, 0, 1, 0], [], []>} : vector<8x8xf32>, vector<8x8xf32>, vector<8x8xf32> -> vector<8x8xf32>
    %20 = vector.shape_cast %10 : vector<8x8xf32> to vector<1x8x8xf32>
    %21 = vector.shape_cast %13 : vector<8x8xf32> to vector<1x8x8xf32>
    %22 = vector.shape_cast %16 : vector<8x8xf32> to vector<1x8x8xf32>
    %23 = vector.shape_cast %19 : vector<8x8xf32> to vector<1x8x8xf32>
    %24 = tpu.concatenate %20, %21, %22, %23 in 0 : vector<1x8x8xf32>, vector<1x8x8xf32>, vector<1x8x8xf32>, vector<1x8x8xf32> -> vector<4x8x8xf32>
    %cst_12 = arith.constant dense<0xFF800000> : vector<4x8xf32>
    %25 = vector.multi_reduction <maximumf>, %24, %cst_12 [2] : vector<4x8x8xf32> to vector<4x8xf32>
    %26 = vector.shape_cast %25 : vector<4x8xf32> to vector<4x8x1xf32>
    %27 = vector.broadcast %26 : vector<4x8x1xf32> to vector<4x8x8xf32>
    %28 = arith.subf %24, %27 : vector<4x8x8xf32>
    %29 = math.exp %28 : vector<4x8x8xf32>
    %cst_13 = arith.constant dense<0.000000e+00> : vector<4x8xf32>
    %30 = vector.multi_reduction <add>, %29, %cst_13 [2] : vector<4x8x8xf32> to vector<4x8xf32>
    %31 = vector.shape_cast %30 : vector<4x8xf32> to vector<4x8x1xf32>
    %32 = tpu.reciprocal %31 : vector<4x8x1xf32> -> vector<4x8x1xf32>
    %33 = vector.broadcast %32 : vector<4x8x1xf32> to vector<4x8x8xf32>
    %34 = arith.mulf %29, %33 : vector<4x8x8xf32>
    %c0_14 = arith.constant 0 : index
    %c0_15 = arith.constant 0 : index
    %c0_16 = arith.constant 0 : index
    %c0_17 = arith.constant 0 : index
    %35 = vector.load %arg5[%c0_14, %c0_15, %c0_16, %c0_17] : memref<1x4x8x8xf32, #tpu.memory_space<vmem>>, vector<1x4x8x8xf32>
    %36 = vector.shape_cast %35 : vector<1x4x8x8xf32> to vector<4x8x8xf32>
    %37 = vector.shape_cast %34 : vector<4x8x8xf32> to vector<1x4x8x8xf32>
    tpu.vector_store %arg5[%c0_14, %c0_15, %c0_16, %c0_17], %37 {strides = array<i32>} : memref<1x4x8x8xf32, #tpu.memory_space<vmem>>, vector<1x4x8x8xf32>,
    %cst_18 = arith.constant dense<0.000000e+00> : vector<4x8xf32>
    %38 = vector.multi_reduction <add>, %34, %cst_18 [1] : vector<4x8x8xf32> to vector<4x8xf32>
    %cst_19 = arith.constant dense<0.000000e+00> : vector<32xf32>
    %39 = vector.multi_reduction <add>, %7, %cst_19 [0] : vector<8x32xf32> to vector<32xf32>
    %40 = vector.extract_strided_slice %38 {offsets = [0, 0], sizes = [1, 8], strides = [1, 1]} : vector<4x8xf32> to vector<1x8xf32>
    %41 = vector.shape_cast %40 : vector<1x8xf32> to vector<8xf32>
    %42 = vector.shape_cast %41 : vector<8xf32> to vector<8x1xf32>
    %43 = vector.extract_strided_slice %39 {offsets = [0], sizes = [8], strides = [1]} : vector<32xf32> to vector<8xf32>
    %44 = vector.shape_cast %43 : vector<8xf32> to vector<1x8xf32>
    %45 = vector.broadcast %42 : vector<8x1xf32> to vector<8x8xf32>
    %46 = vector.broadcast %44 : vector<1x8xf32> to vector<8x8xf32>
    %47 = arith.mulf %45, %46 : vector<8x8xf32>
    %48 = vector.extract_strided_slice %38 {offsets = [1, 0], sizes = [1, 8], strides = [1, 1]} : vector<4x8xf32> to vector<1x8xf32>
    %49 = vector.shape_cast %48 : vector<1x8xf32> to vector<8xf32>
    %50 = vector.shape_cast %49 : vector<8xf32> to vector<8x1xf32>
    %51 = vector.extract_strided_slice %39 {offsets = [8], sizes = [8], strides = [1]} : vector<32xf32> to vector<8xf32>
    %52 = vector.shape_cast %51 : vector<8xf32> to vector<1x8xf32>
    %53 = vector.broadcast %50 : vector<8x1xf32> to vector<8x8xf32>
    %54 = vector.broadcast %52 : vector<1x8xf32> to vector<8x8xf32>
    %55 = arith.mulf %53, %54 : vector<8x8xf32>
    %56 = vector.extract_strided_slice %38 {offsets = [2, 0], sizes = [1, 8], strides = [1, 1]} : vector<4x8xf32> to vector<1x8xf32>
    %57 = vector.shape_cast %56 : vector<1x8xf32> to vector<8xf32>
    %58 = vector.shape_cast %57 : vector<8xf32> to vector<8x1xf32>
    %59 = vector.extract_strided_slice %39 {offsets = [16], sizes = [8], strides = [1]} : vector<32xf32> to vector<8xf32>
    %60 = vector.shape_cast %59 : vector<8xf32> to vector<1x8xf32>
    %61 = vector.broadcast %58 : vector<8x1xf32> to vector<8x8xf32>
    %62 = vector.broadcast %60 : vector<1x8xf32> to vector<8x8xf32>
    %63 = arith.mulf %61, %62 : vector<8x8xf32>
    %64 = vector.extract_strided_slice %38 {offsets = [3, 0], sizes = [1, 8], strides = [1, 1]} : vector<4x8xf32> to vector<1x8xf32>
    %65 = vector.shape_cast %64 : vector<1x8xf32> to vector<8xf32>
    %66 = vector.shape_cast %65 : vector<8xf32> to vector<8x1xf32>
    %67 = vector.extract_strided_slice %39 {offsets = [24], sizes = [8], strides = [1]} : vector<32xf32> to vector<8xf32>
    %68 = vector.shape_cast %67 : vector<8xf32> to vector<1x8xf32>
    %69 = vector.broadcast %66 : vector<8x1xf32> to vector<8x8xf32>
    %70 = vector.broadcast %68 : vector<1x8xf32> to vector<8x8xf32>
    %71 = arith.mulf %69, %70 : vector<8x8xf32>
    %72 = tpu.concatenate %47, %55, %63, %71 in 1 : vector<8x8xf32>, vector<8x8xf32>, vector<8x8xf32>, vector<8x8xf32> -> vector<8x32xf32>
    %c0_20 = arith.constant 0 : index
    %c0_21 = arith.constant 0 : index
    %c0_22 = arith.constant 0 : index
    %73 = vector.load %arg4[%c0_20, %c0_21, %c0_22] : memref<1x8x32xf32, #tpu.memory_space<vmem>>, vector<1x8x32xf32>
    %74 = vector.shape_cast %73 : vector<1x8x32xf32> to vector<8x32xf32>
    %75 = vector.shape_cast %72 : vector<8x32xf32> to vector<1x8x32xf32>
    tpu.vector_store %arg4[%c0_20, %c0_21, %c0_22], %75 {strides = array<i32>} : memref<1x8x32xf32, #tpu.memory_space<vmem>>, vector<1x8x32xf32>,
    return
  }
  func.func @transform_0(%arg0: i32) -> (i32, i32, i32) {
    %c0_i32 = arith.constant 0 : i32
    %c0_i32_0 = arith.constant 0 : i32
    %c0_i32_1 = arith.constant 0 : i32
    return %arg0, %c0_i32, %c0_i32_0 : i32, i32, i32
  }
  func.func @transform_1(%arg0: i32) -> (i32, i32, i32) {
    %c0_i32 = arith.constant 0 : i32
    %c0_i32_0 = arith.constant 0 : i32
    %c0_i32_1 = arith.constant 0 : i32
    return %arg0, %c0_i32, %c0_i32_0 : i32, i32, i32
  }
  func.func @transform_2(%arg0: i32) -> (i32, i32, i32) {
    %c0_i32 = arith.constant 0 : i32
    %c0_i32_0 = arith.constant 0 : i32
    %c0_i32_1 = arith.constant 0 : i32
    return %arg0, %c0_i32, %c0_i32_0 : i32, i32, i32
  }
  func.func @transform_3(%arg0: i32) -> (i32, i32, i32) {
    %c0_i32 = arith.constant 0 : i32
    %c0_i32_0 = arith.constant 0 : i32
    %c0_i32_1 = arith.constant 0 : i32
    return %arg0, %c0_i32, %c0_i32_0 : i32, i32, i32
  }
  func.func @transform_4(%arg0: i32) -> (i32, i32, i32, i32) {
    %c0_i32 = arith.constant 0 : i32
    %c0_i32_0 = arith.constant 0 : i32
    %c0_i32_1 = arith.constant 0 : i32
    %c0_i32_2 = arith.constant 0 : i32
    return %arg0, %c0_i32, %c0_i32_0, %c0_i32_1 : i32, i32, i32, i32
  }
}

</mosaic_0001>

<bundles_post_ra>
// kernel: tpu_custom_call.1
= control target key start
LH: loop header
LB: loop body
LE: loop exit
PB: predicated region body
PF: predicated region fallthrough
CT: control target
= control target key end

     0   :  { %s1543_s0 = inlined_call_operand.hbm [shape: f32[2,8,32], index: 0, kind: input, shape index: {}]   ;;  %s1544_s1 = inlined_call_operand.hbm [shape: f32[2,8,32], index: 1, kind: input, shape index: {}]   ;;  %s1545_s2 = inlined_call_operand.hbm [shape: f32[2,8,32], index: 2, kind: input, shape index: {}]   ;;  %s1546_s3 = inlined_call_operand.hbm [shape: f32[2,8,32], index: 3, kind: output, shape index: {0}]   ;;  %s1547_s4 = inlined_call_operand.hbm [shape: f32[2,4,8,8], index: 4, kind: output, shape index: {1}]  }
   0x1   :  { %1552 = sst [smem:[#allocation17_spill]] %s1543_s0 }
   0x2   :  { %1553 = sst [smem:[#allocation18_spill]] %s1544_s1 }
   0x3   :  { %10 = vsyncpa [#allocation3], 0 }
   0x4   :  { %12 = vsyncpa [#allocation3 + $0x1], 0 }
   0x5   :  { %13 = vsyncpa [#allocation6], 0 }
   0x6   :  { %15 = vsyncpa [#allocation6 + $0x1], 0 }
   0x7   :  { %16 = vsyncpa [#allocation4], 0 }
   0x8   :  { %18 = vsyncpa [#allocation4 + $0x1], 0 }
   0x9   :  { %19 = vsyncpa [#allocation10], 0 }
   0xa   :  { %21 = vsyncpa [#allocation10 + $0x1], 0  ;;  %s1260_s15 = smov 0   ;;  %s1262_s16 = smov 0  }
   0xb   :  { %s1264_s17 = smov 0   ;;  %s1266_s18 = smov 0  }
   0xc LB: > { %1554 = sst [smem:[#allocation15_spill]] %s1217_s17  ;;  %s1281_s19 = sadd.s32 4294967295, %s1221_s18   ;;  %s1221_s18 = sphi %s1266_s18, %s1575_s18   ;;  %s1217_s17 = sphi %s1264_s17, %s1572_s17   ;;  %s1213_s16 = sphi %s1262_s16, %s1574_s16   ;;  %s1209_s15 = sphi %s1260_s15, %s1573_s15  }
   0xd   : > { %s896_s20 = sadd.s32 4294967294, %s1221_s18   ;;  %s1285_s21 = sadd.s32 1, %s1221_s18  }
   0xe   : > { %s34_s22 = sadd.s32 1, %s1217_s17  ;;  %s31_s23 = ssub.s32 %s1221_s18, %s1285_s21 }
   0xf   : > { %p41_p0 = scmp.ne.s32.totalorder %s1217_s17, %s1213_s16  ;;  %p32_p1 = scmp.eq.s32.totalorder %s31_s23, 0 }
  0x10   : > { %p42_p2 = scmp.eq.s32.totalorder %s1221_s18, 0  ;;  %p47_p3 = scmp.ne.s32.totalorder %s1213_s16, %s1209_s15 }
  0x11   : > { %p48_p4 = scmp.eq.s32.totalorder %s1281_s19, 0  ;;  %p123_p7 = scmp.eq.s32.totalorder %s1281_s19, 1 }
  0x12   : > { %s1297_s24 = scalar_select %p32_p1, %s1217_s17, %s34_s22  }
  0x13   : > { %p43_p5 = por %p42_p2, %p41_p0  ;;  %p1299_p6 = por %p48_p4, %p47_p3 }
  0x14   : > { %1555 = sst [smem:[#allocation16_spill]] %s1297_s24  ;;  %p129_p8 = scmp.eq.s32.totalorder %s896_s20, 1 }
  0x15   : > { %s1556_s25 = scalar_select %p1299_p6, 1, 0 }
  0x16   : > { %p982_p10 = scmp.lt.s32.totalorder %s1221_s18, 2  ;;  %p1306_p11 = por %p123_p7, %p41_p0 }
  0x17   : > { %p1310_p12 = por %p129_p8, %p47_p3  ;;  %s1548_s28 = sand.u32 1, %s1217_s17  }
  0x18   : > { %s1557_s26 = scalar_select %p1306_p11, 1, 0 }
  0x19   : > { %s1558_s27 = scalar_select %p1310_p12, 1, 0 }
  0x1a   : > { %s1316_s29 = sshll.u32 %s1221_s18, 7  ;;  %s1320_s30 = sshll.u32 %s1548_s28, 3 }
  0x1b   : > { %p1322_p13 = pnand %p982_p10, %p43_p5  ;;  %s193_s6 = sand.u32 1, %s1221_s18  }
  0x1c   : > { %s1560_s1 = sld [smem:[#allocation18_spill]]  ;;  %s197_s10 = scalar_lea.vmem [#allocation5], %s1320_s30 }
  0x1d   : > { %s204_s11 = sshll.u32 %s197_s10, 4  ;;  %s1335_s12 = scalar_lea.sflag [#allocation6], %s193_s6  ;;  %s205_s11 = int_to_ptr.vmem [resolvable:$true] %s204_s11 }
  0x1e   : > { %p1341_p2 = pneg %p1322_p13 }
  0x22   : > { %s1331_s9 = scalar_lea.hbm %s1560_s1, %s1316_s29  ;;  %s1044_s23 = scalar_lea.hbm %s1560_s1, 256 }
  0x23   : > { %s1039_s13 = scalar_lea.hbm %s1331_s9, 128  ;;  %p1045_p5 = scmp.lt.s32.totalorder %s1331_s9, %s1560_s1 }
  0x24   : > { %p1040_p1 = scmp.ne.s32.totalorder %s1331_s9, %s1039_s13  ;;  %p1046_p7 = scmp.lt.s32.totalorder %s1044_s23, %s1039_s13 }
  0x26   : > { %p1042_p3 = pnand %p1341_p2, %p1040_p1  ;;  %p1047_p8 = por %p1046_p7, %p1045_p5 }
  0x28   : > { %p1043_p4 = pneg %p1042_p3 }
  0x2a   : > { %p1048_p10 = pnand %p1047_p8, %p1043_p4 }
  0x2c   : > { %1051 = shalt.err (!%p1048_p10)
}
  0x2d   : > { %s1052_s6 = scalar_lea.vmem %s205_s11, 128  ;;  %s1223_s10 = smov [#allocation5]  }
  0x2e   : > { %p1053_p9 = scmp.ne.s32.totalorder %s205_s11, %s1052_s6  ;;  %s1057_s28 = sshll.u32 %s1223_s10, 4  ;;  %s1058_s28 = int_to_ptr.vmem [resolvable:$false] %s1057_s28 }
  0x2f   : > { %s1059_s24 = scalar_lea.vmem %s1058_s28, 256  ;;  %p1060_p1 = scmp.lt.s32.totalorder %s205_s11, %s1058_s28 }
  0x30   : > { %p1055_p0 = pnand %p1053_p9, %p1341_p2  ;;  %p1061_p3 = scmp.lt.s32.totalorder %s1059_s24, %s1052_s6 }
  0x32   : > { %p1056_p12 = pneg %p1055_p0  ;;  %p1062_p11 = por %p1061_p3, %p1060_p1 }
  0x34   : > { %p1063_p6 = pnand %p1062_p11, %p1056_p12 }
  0x36   : > { %1066 = shalt.err (!%p1063_p6)
}
  0x37   : > { %971 = dma.hbm_to_vmem [thread:$0]  (!%p1322_p13), %s1331_s9, 128, %s205_s11, %s1335_s12  }
  0x38   : > { %p227_p9 = scmp.lt.s32.totalorder %s1221_s18, 3  ;;  %s1562_s0 = sld [smem:[#allocation17_spill]] }
  0x39   : > { %p1563_p0 = scmp.ge.s32.totalorder %s1221_s18, 1  ;;  %s179_s22 = scalar_lea.vmem [#allocation2], %s1320_s30 }
  0x3a   : > { %s186_s23 = sshll.u32 %s179_s22, 4  ;;  %s1565_s7 = sand.u32 1, %s1217_s17   ;;  %s187_s23 = int_to_ptr.vmem [resolvable:$true] %s186_s23 }
  0x3b   : > { %p1369_p6 = pnand %p1563_p0, %p227_p9  ;;  %s176_s8 = scalar_lea.sflag [#allocation3], %s1565_s7 }
  0x3d   : > { %s1564_s24 = scalar_select %p1369_p6, 1, 0 }
  0x3e   : > { %s1365_s28 = scalar_lea.hbm %s1562_s0, %s1316_s29  ;;  %s1072_s10 = scalar_lea.hbm %s1562_s0, 256 }
  0x3f   : > { %s1067_s9 = scalar_lea.hbm %s1365_s28, 128  ;;  %p1073_p5 = scmp.lt.s32.totalorder %s1365_s28, %s1562_s0 }
  0x40   : > { %p1068_p11 = scmp.ne.s32.totalorder %s1365_s28, %s1067_s9  ;;  %p1074_p7 = scmp.lt.s32.totalorder %s1072_s10, %s1067_s9 }
  0x42   : > { %p1070_p12 = pnand %p1068_p11, %p1341_p2  ;;  %p1075_p8 = por %p1074_p7, %p1073_p5 }
  0x44   : > { %p1071_p4 = pneg %p1070_p12 }
  0x46   : > { %p1076_p10 = pnand %p1075_p8, %p1071_p4 }
  0x48   : > { %1079 = shalt.err (!%p1076_p10)
}
  0x49   : > { %s1080_s22 = scalar_lea.vmem %s187_s23, 128  ;;  %s1224_s7 = smov [#allocation2]  }
  0x4a   : > { %p1081_p1 = scmp.ne.s32.totalorder %s187_s23, %s1080_s22  ;;  %s1085_s1 = sshll.u32 %s1224_s7, 4  ;;  %s1086_s1 = int_to_ptr.vmem [resolvable:$false] %s1085_s1 }
  0x4b   : > { %s1087_s17 = scalar_lea.vmem %s1086_s1, 256  ;;  %p1088_p0 = scmp.lt.s32.totalorder %s187_s23, %s1086_s1 }
  0x4c   : > { %p1083_p3 = pnand %p1081_p1, %p1341_p2  ;;  %p1089_p11 = scmp.lt.s32.totalorder %s1087_s17, %s1080_s22 }
  0x4e   : > { %p1084_p9 = pneg %p1083_p3  ;;  %p1090_p12 = por %p1089_p11, %p1088_p0 }
  0x50   : > { %p1091_p6 = pnand %p1090_p12, %p1084_p9 }
  0x52   : > { %1094 = shalt.err (!%p1091_p6)
}
  0x53   : > { %968 = dma.hbm_to_vmem [thread:$0]  (!%p1322_p13), %s1365_s28, 128, %s187_s23, %s176_s8  }
  0x54   : > { %s220_s6 = scalar_lea.hbm %s1545_s2, %s1316_s29  ;;  %s215_s10 = scalar_lea.vmem [#allocation7], %s1320_s30 }
  0x55   : > { %s222_s13 = sshll.u32 %s215_s10, 4  ;;  %s1095_s20 = scalar_lea.hbm %s220_s6, 128  ;;  %s223_s13 = int_to_ptr.vmem [resolvable:$true] %s222_s13 }
  0x56   : > { %p1096_p4 = scmp.ne.s32.totalorder %s220_s6, %s1095_s20  ;;  %s1100_s22 = scalar_lea.hbm %s1545_s2, 256 }
  0x57   : > { %p1101_p6 = scmp.lt.s32.totalorder %s220_s6, %s1545_s2  ;;  %p1102_p8 = scmp.lt.s32.totalorder %s1100_s22, %s1095_s20 }
  0x58   : > { %p1098_p5 = pnand %p1096_p4, %p1341_p2 }
  0x59   : > { %p1103_p10 = por %p1102_p8, %p1101_p6 }
  0x5a   : > { %p1099_p7 = pneg %p1098_p5 }
  0x5c   : > { %p1104_p1 = pnand %p1103_p10, %p1099_p7 }
  0x5e   : > { %1107 = shalt.err (!%p1104_p1)
}
  0x5f   : > { %s1108_s29 = scalar_lea.vmem %s223_s13, 128  ;;  %s1225_s30 = smov [#allocation7]  }
  0x60   : > { %p1109_p3 = scmp.ne.s32.totalorder %s223_s13, %s1108_s29  ;;  %s1113_s28 = sshll.u32 %s1225_s30, 4  ;;  %s1114_s28 = int_to_ptr.vmem [resolvable:$false] %s1113_s28 }
  0x61   : > { %s1115_s23 = scalar_lea.vmem %s1114_s28, 256  ;;  %p1116_p11 = scmp.lt.s32.totalorder %s223_s13, %s1114_s28 }
  0x62   : > { %p1111_p9 = pnand %p1109_p3, %p1341_p2  ;;  %p1117_p12 = scmp.lt.s32.totalorder %s1115_s23, %s1108_s29 }
  0x64   : > { %p1112_p0 = pneg %p1111_p9  ;;  %p1118_p4 = por %p1117_p12, %p1116_p11 }
  0x66   : > { %p1119_p5 = pnand %p1118_p4, %p1112_p0 }
  0x68   : > { %1122 = shalt.err (!%p1119_p5)
}
  0x69   : > { %974 = dma.hbm_to_vmem [thread:$0]  (!%p1322_p13), %s220_s6, 128, %s223_s13, %s1335_s12  }
  0x6a   : > { %p1566_p7 = scmp.ne.s32.totalorder %s1564_s24, 0 }
  0x6b   : > { %s1413_s0 = sand.u32 (!%p1566_p7), 1, %s1213_s16   ;;  %p1567_p2 = scmp.ne.s32.totalorder (!%p1566_p7), %s1556_s25, 0 }
  0x6c   : > { %231 = sbr.rel (%p1566_p7) target bundleno = 906 (0x38a), region = 32  ;;  %s1416_s14 = sshll.u32 (!%p1566_p7), %s1413_s0, 3 }
  0x6d   : > { %s234_s8 = scalar_lea.sflag (!%p1566_p7), [#allocation3], %s1413_s0  ;;  %s237_s9 = scalar_lea.vmem (!%p1566_p7), [#allocation2], %s1416_s14 }
  0x71   : > { %1192 = dma.done.wait (%p1567_p2), %s234_s8, 128  }
  0x72   : > { %1194 = vsyncadd (%p1567_p2), %s234_s8, 4294967168  ;;  %s242_s5 = sand.u32 1, %s1281_s19   ;;  %s246_s24 = scalar_lea.vmem [#allocation5], %s1416_s14 }
  0x73   : > { %s243_s12 = scalar_lea.sflag [#allocation6], %s242_s5 }
  0x74   : > { %1196 = dma.done.wait (%p1567_p2), %s243_s12, 256  }
  0x75   : > { %1198 = vsyncadd (%p1567_p2), %s243_s12, 4294967040  ;;  %v1226_v0 = vmov 0.0   ;;  %vm1227_vm0 = vmmov 0   ;;  %vm299_vm1 = vcmask 64512   ;;  %v297_v1 = vld [vmem:[%s246_s24] sm:$0xff]  ;;  %v295_v2 = vld [vmem:[%s237_s9] sm:$0xff] }
  0x76   : > { %935 = vmatprep.subr.mxu0 %v1226_v0  ;;  %937 = vmatprep.mubr.msk.f32.mxu0 %vm1227_vm0, %v1226_v0  ;;  %s1228_s11 = smov 120   ;;  %v296_v3 = vmul.f32 0.17677669, %v295_v2  ;;  %s1229_s6 = smov 112  }
  0x77   : > { %940 = vmatprep.subr.mxu1 %v1226_v0  ;;  %942 = vmatprep.mubr.msk.f32.mxu1 %vm1227_vm0, %v1226_v0  ;;  %s1230_s25 = smov 104   ;;  %s910_s10 = sshll.u32 %s1413_s0, 5 }
  0x78   : > { %378 = vrot.lane.b32.xlu0 %v297_v1, %s1228_s11  ;;  %936 = vmatpush3.xpose.msk.msra.mxu0 %vm299_vm1, %v297_v1  ;;  %s1451_s13 = scalar_lea.vmem [#allocation9], %s910_s10  ;;  %s926_s20 = sshll.u32 %s1281_s19, 9 }
  0x79   : > { %456 = vrot.lane.b32.xlu1 %v297_v1, %s1229_s6  ;;  %945 = vmatprep.subr.mxu0 %v1226_v0  ;;  %s748_s1 = sshll.u32 %s1451_s13, 4  ;;  %s1470_s7 = scalar_lea.hbm %s1547_s4, %s926_s20  ;;  %s1472_s1 = int_to_ptr.vmem [resolvable:$true] %s748_s1 }
  0x7a   : > { %s722_s29 = scalar_lea.sflag [#allocation10], %s1413_s0  ;;  %s1123_s30 = scalar_lea.vmem %s1472_s1, 512 }
  0x7b   : > { %938 = vmatmul.mubr.msk.f32.vlgmr.msra.gmra.mxu0 %vm299_vm1, %v296_v3  ;;  %p1124_p13 = scmp.ne.s32.totalorder %s1472_s1, %s1123_s30  ;;  %p1568_p6 = scmp.ne.s32.totalorder %s1557_s26, 0 }
  0x7c   : > { %376 = vrot.lane.b32.xlu0 %v296_v3, %s1228_s11  ;;  %947 = vmatprep.mubr.msk.f32.mxu0 %vm1227_vm0, %v1226_v0  ;;  %s1231_s28 = smov [#allocation9]  }
  0x7d   : > { %534 = vrot.lane.b32.xlu1 %v297_v1, %s1230_s25  ;;  %p1125_p8 = pnand %p1124_p13, %p1568_p6  ;;  %s1127_s23 = sshll.u32 %s1231_s28, 4  ;;  %s1128_s23 = int_to_ptr.vmem [resolvable:$false] %s1127_s23 }
  0x7e   : > { %s1129_s8 = scalar_lea.vmem %s1128_s23, 1024  ;;  %p1130_p1 = scmp.lt.s32.totalorder %s1472_s1, %s1128_s23 }
  0x7f   : > { %p1126_p10 = pneg %p1125_p8  ;;  %p1131_p3 = scmp.lt.s32.totalorder %s1129_s8, %s1123_s30 }
  0x80   : > { %454 = vrot.lane.b32.xlu0 %v296_v3, %s1229_s6 }
  0x81   : > { %532 = vrot.lane.b32.xlu1 %v296_v3, %s1230_s25  ;;  %p1132_p9 = por %p1131_p3, %p1130_p1 }
  0x83   : > { %p1133_p0 = pnand %p1132_p9, %p1126_p10 }
  0xea   : > { %v379_v4 = vpop.permute.xlu0 %378 }
  0xeb   : > { %941 = vmatpush3.xpose.msk.msra.mxu1 %vm299_vm1, %v379_v4  ;;  %v457_v5 = vpop.permute.xlu1 %456 }
  0xec   : > { %946 = vmatpush3.xpose.msk.msra.mxu0 %vm299_vm1, %v457_v5  ;;  %950 = vmatprep.subr.mxu1 %v1226_v0 }
  0xee   : > { %v377_v6 = vpop.permute.xlu0 %376 }
  0xef   : > { %943 = vmatmul.mubr.msk.f32.vlgmr.msra.gmra.mxu1 %vm299_vm1, %v377_v6  ;;  %v535_v7 = vpop.permute.xlu1 %534 }
  0xf0   : > { %951 = vmatpush3.xpose.msk.msra.mxu1 %vm299_vm1, %v535_v7  ;;  %952 = vmatprep.mubr.msk.f32.mxu1 %vm1227_vm0, %v1226_v0 }
  0xf2   : > { %v455_v8 = vpop.permute.xlu0 %454 }
  0xf3   : > { %948 = vmatmul.mubr.msk.f32.vlgmr.msra.gmra.mxu0 %vm299_vm1, %v455_v8  ;;  %v533_v9 = vpop.permute.xlu1 %532 }
  0xf4   : > { %953 = vmatmul.mubr.msk.f32.vlgmr.msra.gmra.mxu1 %vm299_vm1, %v533_v9 }
 0x13b   : > { %v372_v10 = vpop.f32.mrf.mxu0 }
 0x13c   : > { %v610_v11 = vsel %vm299_vm1, %v372_v10, -inf }
 0x13d   : > { %611 = vmax.xlane.f32.xlu0 %v610_v11  ;;  %v939_v12 = vpop.f32.mrf.mxu0 }
 0x1af   : > { %v450_v13 = vpop.f32.mrf.mxu1 }
 0x1b0   : > { %v613_v14 = vsel %vm299_vm1, %v450_v13, -inf }
 0x1b1   : > { %614 = vmax.xlane.f32.xlu1 %v613_v14  ;;  %v944_v15 = vpop.f32.mrf.mxu1 }
 0x1b3   : > { %v528_v16 = vpop.f32.mrf.mxu0 }
 0x1b4   : > { %v606_v17 = vpop.f32.mrf.mxu1  ;;  %v616_v18 = vsel %vm299_vm1, %v528_v16, -inf }
 0x1b5   : > { %617 = vmax.xlane.f32.xlu0 %v616_v18  ;;  %v949_v19 = vpop.f32.mrf.mxu0  ;;  %v619_v21 = vsel %vm299_vm1, %v606_v17, -inf }
 0x1b6   : > { %v954_v20 = vpop.f32.mrf.mxu1 }
 0x1b9   : > { %620 = vmax.xlane.f32.xlu0 %v619_v21 }
 0x1c6   : > { %v612_v22 = vpop.xlane.xlu0 %611 }
 0x1c7   : > { %v622_v23 = vsub.f32 %v372_v10, %v612_v22 }
 0x1c9   : > { %v626_v24 = vmul.f32 1.442695, %v622_v23 }
 0x1cb   : > { %1023 = vpow2.f32 %v626_v24 }
 0x1d8   : > { %v1024_v25 = vpop.eup %1023 }
 0x1d9   : > { %v634_v26 = vsel %vm299_vm1, %v1024_v25, 0.0 }
 0x1da   : > { %635 = vadd.xlane.f32.xlu1 %v634_v26 }
 0x23a   : > { %v615_v27 = vpop.xlane.xlu1 %614 }
 0x23b   : > { %v623_v28 = vsub.f32 %v450_v13, %v615_v27 }
 0x23d   : > { %v628_v29 = vmul.f32 1.442695, %v623_v28 }
 0x23e   : > { %v618_v30 = vpop.xlane.xlu0 %617 }
 0x23f   : > { %1025 = vpow2.f32 %v628_v29  ;;  %v624_v31 = vsub.f32 %v528_v16, %v618_v30 }
 0x241   : > { %v630_v32 = vmul.f32 1.442695, %v624_v31 }
 0x242   : > { %v621_v33 = vpop.xlane.xlu0 %620 }
 0x243   : > { %1027 = vpow2.f32 %v630_v32  ;;  %v625_v34 = vsub.f32 %v606_v17, %v621_v33 }
 0x245   : > { %v632_v35 = vmul.f32 1.442695, %v625_v34 }
 0x247   : > { %1029 = vpow2.f32 %v632_v35 }
 0x24c   : > { %v1026_v36 = vpop.eup %1025 }
 0x24d   : > { %v637_v37 = vsel %vm299_vm1, %v1026_v36, 0.0 }
 0x24e   : > { %638 = vadd.xlane.f32.xlu0 %v637_v37 }
 0x250   : > { %v1028_v38 = vpop.eup %1027 }
 0x251   : > { %v640_v39 = vsel %vm299_vm1, %v1028_v38, 0.0 }
 0x252   : > { %641 = vadd.xlane.f32.xlu1 %v640_v39 }
 0x254   : > { %v1030_v40 = vpop.eup %1029 }
 0x255   : > { %v643_v41 = vsel %vm299_vm1, %v1030_v40, 0.0 }
 0x256   : > { %644 = vadd.xlane.f32.xlu0 %v643_v41 }
 0x263   : > { %v636_v42 = vpop.xlane.xlu1 %635 }
 0x264   : > { %1031 = vrcp.f32 %v636_v42 }
 0x271   : > { %v1032_v43 = vpop.eup %1031 }
 0x272   : > { %v650_v44 = vmul.f32 %v1032_v43, %v1024_v25 }
 0x274   : > { %654 = vst.msk [vmem:[%s1451_s13] sm:$0xff] %vm299_vm1, %v650_v44  ;;  %v658_v45 = vsel %vm299_vm1, %v650_v44, 0.0 }
 0x275   : > { %v659_v46 = vrot.slane %v658_v45, 4 }
 0x277   : > { %v660_v47 = vadd.f32 %v659_v46, %v658_v45 }
 0x279   : > { %v661_v48 = vrot.slane %v660_v47, 2 }
 0x27b   : > { %v662_v49 = vadd.f32 %v661_v48, %v660_v47 }
 0x27d   : > { %v663_v50 = vrot.slane %v662_v49, 1 }
 0x27f   : > { %v664_v51 = vadd.f32 %v663_v50, %v662_v49 }
 0x281   : > { %695 = vbcast.lane.b32.xlu1 %v664_v51, 256 }
 0x2d7   : > { %v639_v52 = vpop.xlane.xlu0 %638 }
 0x2d8   : > { %1033 = vrcp.f32 %v639_v52 }
 0x2db   : > { %v642_v53 = vpop.xlane.xlu1 %641 }
 0x2dc   : > { %1035 = vrcp.f32 %v642_v53 }
 0x2df   : > { %v645_v54 = vpop.xlane.xlu0 %644 }
 0x2e0   : > { %1037 = vrcp.f32 %v645_v54 }
 0x2e5   : > { %v1034_v55 = vpop.eup %1033 }
 0x2e6   : > { %v651_v56 = vmul.f32 %v1034_v55, %v1026_v36 }
 0x2e8   : > { %v665_v57 = vsel %vm299_vm1, %v651_v56, 0.0  ;;  %655 = vst.msk [vmem:[%s1451_s13 + $0x8] sm:$0xff] %vm299_vm1, %v651_v56 }
 0x2e9   : > { %v1036_v58 = vpop.eup %1035  ;;  %v666_v59 = vrot.slane %v665_v57, 4 }
 0x2ea   : > { %v652_v60 = vmul.f32 %v1036_v58, %v1028_v38 }
 0x2eb   : > { %v667_v61 = vadd.f32 %v666_v59, %v665_v57 }
 0x2ec   : > { %v672_v62 = vsel %vm299_vm1, %v652_v60, 0.0  ;;  %656 = vst.msk [vmem:[%s1451_s13 + $0x10] sm:$0xff] %vm299_vm1, %v652_v60 }
 0x2ed   : > { %v1038_v63 = vpop.eup %1037  ;;  %v668_v0 = vrot.slane %v667_v61, 2  ;;  %v673_v1 = vrot.slane %v672_v62, 4 }
 0x2ee   : > { %v653_v2 = vmul.f32 %v1038_v63, %v1030_v40 }
 0x2ef   : > { %v669_v3 = vadd.f32 %v668_v0, %v667_v61  ;;  %v674_v4 = vadd.f32 %v673_v1, %v672_v62 }
 0x2f0   : > { %v679_v5 = vsel %vm299_vm1, %v653_v2, 0.0  ;;  %657 = vst.msk [vmem:[%s1451_s13 + $0x18] sm:$0xff] %vm299_vm1, %v653_v2 }
 0x2f1   : > { %v670_v6 = vrot.slane %v669_v3, 1  ;;  %v675_v7 = vrot.slane %v674_v4, 2  ;;  %v680_v8 = vrot.slane %v679_v5, 4 }
 0x2f3   : > { %v671_v9 = vadd.f32 %v670_v6, %v669_v3  ;;  %v676_v10 = vadd.f32 %v675_v7, %v674_v4  ;;  %v681_v11 = vadd.f32 %v680_v8, %v679_v5 }
 0x2f5   : > { %699 = vbcast.lane.b32.xlu0 %v671_v9, 256  ;;  %v677_v12 = vrot.slane %v676_v10, 1  ;;  %v682_v13 = vrot.slane %v681_v11, 2 }
 0x2f7   : > { %v678_v14 = vadd.f32 %v677_v12, %v676_v10  ;;  %v683_v15 = vadd.f32 %v682_v13, %v681_v11 }
 0x2f8   : > { %1136 = shalt.err (!%p1133_p0)
}
 0x2f9   : > { %s1137_s9 = scalar_lea.hbm %s1470_s7, 512  ;;  %s1141_s24 = scalar_lea.hbm %s1547_s4, 1024 }
 0x2fa   : > { %p1138_p11 = scmp.ne.s32.totalorder %s1470_s7, %s1137_s9  ;;  %p1142_p5 = scmp.lt.s32.totalorder %s1470_s7, %s1547_s4 }
 0x2fb   : > { %p1143_p7 = scmp.lt.s32.totalorder %s1141_s24, %s1137_s9 }
 0x2fc   : > { %p1139_p12 = pnand %p1138_p11, %p1568_p6 }
 0x2fd   : > { %p1144_p2 = por %p1143_p7, %p1142_p5 }
 0x2fe   : > { %p1140_p4 = pneg %p1139_p12 }
 0x300   : > { %p1145_p13 = pnand %p1144_p2, %p1140_p4 }
 0x302   : > { %1148 = shalt.err (!%p1145_p13)
}
 0x303   : > { %s1232_s25 = smov 128   ;;  %s1233_s10 = smov 8   ;;  %703 = vbcast.lane.b32.xlu1 %v678_v14, 256  ;;  %v684_v16 = vrot.slane %v683_v15, 1  ;;  %vm686_vm2 = vcmask 261120   ;;  %v696_v25 = vpop.permute.xlu1 %695  ;;  %vm711_vm3 = vcmask 130048  }
 0x304   : > { %962 = dma.vmem_to_hbm [thread:$0]  (%p1568_p6), %s1472_s1, 512, %s1470_s7, %s722_s29, %s1232_s25, %s1232_s25, %s1233_s10   ;;  %vm713_vm4 = vcmask 195584  }
 0x305   : > { %v685_v17 = vadd.f32 %v684_v16, %v683_v15  ;;  %s255_s13 = scalar_lea.vmem [#allocation7], %s1416_s14  ;;  %s921_s20 = sshll.u32 %s1281_s19, 7 }
 0x306   : > { %v298_v18 = vld [vmem:[%s255_s13] sm:$0xff]  ;;  %s287_s1 = scalar_lea.vmem [#allocation8], %s1416_s14  ;;  %s1505_s29 = scalar_lea.hbm %s1546_s3, %s921_s20 }
 0x307   : > { %707 = vbcast.lane.b32.xlu1 %v685_v17, 256  ;;  %v687_v19 = vsel %vm686_vm2, %v298_v18, 0.0  ;;  %s735_s17 = sshll.u32 %s287_s1, 4  ;;  %s717_s30 = scalar_lea.sflag [#allocation4], %s1413_s0  ;;  %s736_s17 = int_to_ptr.vmem [resolvable:$true] %s735_s17 }
 0x308   : > { %v688_v20 = vrot.slane %v687_v19, 4  ;;  %s1149_s28 = scalar_lea.vmem %s736_s17, 128  ;;  %s1234_s19 = smov [#allocation8]  }
 0x309   : > { %p1150_p8 = scmp.ne.s32.totalorder %s736_s17, %s1149_s28  ;;  %s1153_s14 = sshll.u32 %s1234_s19, 4  ;;  %s1154_s14 = int_to_ptr.vmem [resolvable:$false] %s1153_s14 }
 0x30a   : > { %v689_v21 = vadd.f32 %v688_v20, %v687_v19  ;;  %s1155_s23 = scalar_lea.vmem %s1154_s14, 256  ;;  %p1156_p3 = scmp.lt.s32.totalorder %s736_s17, %s1154_s14 }
 0x30b   : > { %p1151_p10 = pnand %p1150_p8, %p1568_p6  ;;  %p1157_p9 = scmp.lt.s32.totalorder %s1155_s23, %s1149_s28 }
 0x30c   : > { %v690_v22 = vrot.slane %v689_v21, 2 }
 0x30d   : > { %p1152_p1 = pneg %p1151_p10  ;;  %p1158_p0 = por %p1157_p9, %p1156_p3 }
 0x30e   : > { %v691_v23 = vadd.f32 %v690_v22, %v689_v21 }
 0x30f   : > { %p1159_p11 = pnand %p1158_p0, %p1152_p1 }
 0x310   : > { %v692_v24 = vrot.slane %v691_v23, 1 }
 0x312   : > { %v693_v27 = vadd.f32 %v692_v24, %v691_v23 }
 0x314   : > { %v697_v31 = vmul.f32 %v696_v25, %v693_v27 }
 0x367   : > { %v700_v26 = vpop.permute.xlu0 %699 }
 0x368   : > { %v701_v29 = vmul.f32 %v700_v26, %v693_v27 }
 0x36a   : > { %v710_v33 = vsel %vm299_vm1, %v697_v31, %v701_v29 }
 0x375   : > { %v704_v28 = vpop.permute.xlu1 %703 }
 0x376   : > { %v705_v30 = vmul.f32 %v704_v28, %v693_v27 }
 0x378   : > { %v712_v35 = vsel %vm711_vm3, %v710_v33, %v705_v30 }
 0x379   : > { %v708_v32 = vpop.permute.xlu1 %707 }
 0x37a   : > { %v709_v34 = vmul.f32 %v708_v32, %v693_v27 }
 0x37c   : > { %v714_v36 = vsel %vm713_vm4, %v712_v35, %v709_v34 }
 0x37d   : > { %715 = vst.msk [vmem:[%s287_s1] sm:$0xff] %vm686_vm2, %v714_v36 }
 0x37e   : > { %1162 = shalt.err (!%p1159_p11)
}
 0x37f   : > { %s1163_s8 = scalar_lea.hbm %s1505_s29, 128  ;;  %s1167_s5 = scalar_lea.hbm %s1546_s3, 256 }
 0x380   : > { %p1164_p12 = scmp.ne.s32.totalorder %s1505_s29, %s1163_s8  ;;  %p1168_p7 = scmp.lt.s32.totalorder %s1505_s29, %s1546_s3 }
 0x381   : > { %p1169_p2 = scmp.lt.s32.totalorder %s1167_s5, %s1163_s8 }
 0x382   : > { %p1165_p4 = pnand %p1164_p12, %p1568_p6 }
 0x383   : > { %p1170_p13 = por %p1169_p2, %p1168_p7 }
 0x384   : > { %p1166_p5 = pneg %p1165_p4 }
 0x386   : > { %p1171_p8 = pnand %p1170_p13, %p1166_p5 }
 0x388   : > { %1174 = shalt.err (!%p1171_p8)
}
 0x389   : > { %961 = dma.vmem_to_hbm [thread:$0]  (%p1568_p6), %s736_s17, 128, %s1505_s29, %s717_s30  }
 0x38a PF: > { %s763_s11 = sand.u32 1, %s1209_s15   ;;  %p1569_p10 = scmp.ne.s32.totalorder %s1558_s27, 0 }
 0x38b   : > { %p1570_p1 = scmp.ge.s32.totalorder %s1221_s18, 2  ;;  %s764_s6 = scalar_lea.sflag [#allocation4], %s763_s11 }
 0x38d   : > { %p976_p3 = pnand %p1570_p1, %p1569_p10 }
 0x38f   : > { %p977_p9 = pneg %p976_p3 }
 0x391   : > { %1200 = dma.done.wait (%p977_p9), %s764_s6, 128  }
 0x392   : > { %1202 = vsyncadd (%p977_p9), %s764_s6, 4294967168  ;;  %s773_s25 = scalar_lea.sflag [#allocation10], %s763_s11 }
 0x393   : > { %1204 = dma.done.wait (%p977_p9), %s773_s25, 512  }
 0x394   : > { %1206 = vsyncadd (%p977_p9), %s773_s25, 4294966784  ;;  %s1571_s26 = sld [smem:[#allocation15_spill]]  ;;  %p24_p6 = scmp.ge.s32.totalorder %s1285_s21, 4  }
 0x395   : > { %s1572_s17 = sld [smem:[#allocation16_spill]]  ;;  %s1573_s15 = smov %s1213_s16 }
 0x396   : > { %s1575_s18 = smov %s1285_s21  ;;  %26 = sbr.rel (!%p24_p6) target bundleno = 12 (0xc), region = 118 }
 0x39a   : > { %s1574_s16 = smov %s1571_s26 }
 0x39b   :  { %778 = vsyncpa [#allocation3], 1 }
 0x39c   :  { %780 = vsyncpa [#allocation3 + $0x1], 1 }
 0x39d   :  { %781 = vsyncpa [#allocation6], 1 }
 0x39e   :  { %783 = vsyncpa [#allocation6 + $0x1], 1 }
 0x39f   :  { %784 = vsyncpa [#allocation4], 1 }
 0x3a0   :  { %786 = vsyncpa [#allocation4 + $0x1], 1 }
 0x3a1   :  { %787 = vsyncpa [#allocation10], 1 }
 0x3a2   :  { %789 = vsyncpa [#allocation10 + $0x1], 1 }

</bundles_post_ra>
